<compile_context>
chip_gen: v6e
topology: v6e:2x2x1
jax: 0.10.0
libtpu: 0.0.40
codegen_flags: <defaults>
</compile_context>

<pallas_src>
import numpy as np
import jax
import jax.numpy as jnp
from jax import lax
from jax.experimental import pallas as pl
from jax.experimental.pallas import tpu as pltpu


def basic_block_kernel(x_ref, r1_ref, s1_ref, b1_ref, r2_ref, s2_ref, b2_ref,
                       o_ref):
    """One batch element per grid step.

    x_ref : (1, H, W*Cin)        lane-dense input (W and C folded onto lanes)
    r1_ref: (3*W*Cin, W*Cout)    conv1 as a block-banded width matmul (kh-major)
    r2_ref: (3*W*Cout, W*Cout)   conv2, same encoding
    s*/b* : (1, W*Cout)          folded BN scale / bias, tiled across W
    o_ref : (1, H, W*Cout)       lane-dense output
    """
    _, H, WC = x_ref.shape
    x = x_ref[0]                                     # (H, W*Cin) f32

    # kh taps as +-1 row shifts with zero fill (height padding=1), fused along
    # lanes so conv1 is a single MXU dot with K = 3*W*Cin.
    z = jnp.zeros((1, WC), jnp.float32)
    lhs1 = jnp.concatenate(
        [jnp.concatenate([z, x[:-1]], axis=0),       # input row h-1  (kh=0)
         x,                                          # input row h    (kh=1)
         jnp.concatenate([x[1:], z], axis=0)],       # input row h+1  (kh=2)
        axis=1)                                      # (H, 3*W*Cin)

    y1 = jnp.dot(lhs1, r1_ref[...], preferred_element_type=jnp.float32)
    y1 = jnp.maximum(y1 * s1_ref[...] + b1_ref[...], 0.0)   # bn1 + relu (f32)

    WCo = y1.shape[1]
    z2 = jnp.zeros((1, WCo), jnp.float32)
    lhs2 = jnp.concatenate(
        [jnp.concatenate([z2, y1[:-1]], axis=0),
         y1,
         jnp.concatenate([y1[1:], z2], axis=0)],
        axis=1)                                      # (H, 3*W*Cout)

    y2 = jnp.dot(lhs2, r2_ref[...], preferred_element_type=jnp.float32)
    # bn2 + residual (Cin == Cout, identical lane layout) + relu
    y2 = jnp.maximum(y2 * s2_ref[...] + b2_ref[...] + x, 0.0)
    o_ref[0] = y2.astype(o_ref.dtype)


def _conv_width_matrix(w_oihw, W):
    """Encode a 3x3 'same' conv's kw taps + width zero-padding as a dense
    banded matmul operand.

    Returns (3*W*Cin, W*Cout): row = kh*W*Cin + wi*Cin + ci,
    col = wo*Cout + co, value = w[co, ci, kh, kw] with kw = wi - wo + 1
    (zero outside the band / image)."""
    Cout, Cin, KH, KW = w_oihw.shape
    wt = jnp.transpose(w_oihw, (2, 3, 1, 0))               # (kh, kw, Cin, Cout)
    sel = np.zeros((KW, W, W), np.float32)                 # sel[kw, wi, wo]
    for kw in range(KW):
        for wo in range(W):
            wi = wo + kw - 1
            if 0 <= wi < W:
                sel[kw, wi, wo] = 1.0
    r = jnp.einsum('kwv,hkio->hwivo', jnp.asarray(sel), wt)  # (kh,wi,ci,wo,co)
    return r.reshape(KH * W * Cin, W * Cout)


@jax.jit
def basic_block_forward(x_nchw, w1_oihw, w2_oihw, s1, b1, s2, b2):
    """x_nchw: (N, C, H, W) float32 -> (N, C, H, W) float32 (stride=1, no downsample)."""
    N, Cin, H, W = x_nchw.shape
    Cout = w1_oihw.shape[0]
    assert Cin == Cout, "identity residual path requires in_channels == out_channels"

    # NCHW -> lane-dense (N, H, W*C); no spatial padding in HBM.
    x_flat = jnp.transpose(x_nchw, (0, 2, 3, 1)).reshape(N, H, W * Cin)

    r1 = _conv_width_matrix(w1_oihw, W)                    # (3*W*Cin,  W*Cout)
    r2 = _conv_width_matrix(w2_oihw, W)                    # (3*W*Cout, W*Cout)

    # per-channel folded BN scale/bias, tiled across W to match the lane layout
    s1_t = jnp.tile(s1.astype(jnp.float32), W).reshape(1, W * Cout)
    b1_t = jnp.tile(b1.astype(jnp.float32), W).reshape(1, W * Cout)
    s2_t = jnp.tile(s2.astype(jnp.float32), W).reshape(1, W * Cout)
    b2_t = jnp.tile(b2.astype(jnp.float32), W).reshape(1, W * Cout)

    flops = (2 * N * H * (3 * W * Cin) * (W * Cout)
             + 2 * N * H * (3 * W * Cout) * (W * Cout))
    bytes_accessed = 4 * (x_flat.size + r1.size + r2.size
                          + 4 * W * Cout + N * H * W * Cout)

    out_flat = pl.pallas_call(
        basic_block_kernel,
        out_shape=jax.ShapeDtypeStruct((N, H, W * Cout), jnp.float32),
        grid=(N,),
        in_specs=[
            pl.BlockSpec((1, H, W * Cin), lambda n: (n, 0, 0)),
            pl.BlockSpec((3 * W * Cin, W * Cout), lambda n: (0, 0)),
            pl.BlockSpec((1, W * Cout), lambda n: (0, 0)),
            pl.BlockSpec((1, W * Cout), lambda n: (0, 0)),
            pl.BlockSpec((3 * W * Cout, W * Cout), lambda n: (0, 0)),
            pl.BlockSpec((1, W * Cout), lambda n: (0, 0)),
            pl.BlockSpec((1, W * Cout), lambda n: (0, 0)),
        ],
        out_specs=pl.BlockSpec((1, H, W * Cout), lambda n: (n, 0, 0)),
        compiler_params=pltpu.CompilerParams(
            dimension_semantics=("parallel",),        # v7x: shard batch over 2 TCs
            vmem_limit_bytes=32 * 1024 * 1024),
        cost_estimate=pl.CostEstimate(flops=flops, transcendentals=0,
                                      bytes_accessed=bytes_accessed),
    )(x_flat, r1, s1_t, b1_t, r2, s2_t, b2_t)

    return jnp.transpose(out_flat.reshape(N, H, W, Cout), (0, 3, 1, 2))


def ref_forward(x_nchw, w1_oihw, w2_oihw, s1, b1, s2, b2):
    """Pure-JAX reference (inference-mode BN folded to scale/bias)."""
    x = jnp.transpose(x_nchw, (0, 2, 3, 1))
    w1 = jnp.transpose(w1_oihw, (2, 3, 1, 0))
    w2 = jnp.transpose(w2_oihw, (2, 3, 1, 0))
    dn = ('NHWC', 'HWIO', 'NHWC')
    y = lax.conv_general_dilated(x, w1, (1, 1), 'SAME', dimension_numbers=dn)
    y = jnp.maximum(y * s1 + b1, 0.0)
    y = lax.conv_general_dilated(y, w2, (1, 1), 'SAME', dimension_numbers=dn)
    y = jnp.maximum(y * s2 + b2 + x, 0.0)
    return jnp.transpose(y, (0, 3, 1, 2))


if __name__ == "__main__":
    # Module-consistent small shapes: in_channels == out_channels, stride=1, no downsample.
    N, C, H, W = 2, 4, 16, 16

    key = jax.random.PRNGKey(0)
    kx, kw1, kw2, kg1, kb1, km1, kv1, kg2, kb2, km2, kv2 = jax.random.split(key, 11)

    x = jax.random.normal(kx, (N, C, H, W), jnp.float32)

    # conv weights (OIHW, no bias)
    fan_in = C * 9
    w1 = jax.random.normal(kw1, (C, C, 3, 3), jnp.float32) * (2.0 / fan_in) ** 0.5
    w2 = jax.random.normal(kw2, (C, C, 3, 3), jnp.float32) * (2.0 / fan_in) ** 0.5

    # BatchNorm params folded to per-channel scale/bias (eval mode)
    eps = 1e-5
    g1 = 1.0 + 0.1 * jax.random.normal(kg1, (C,), jnp.float32)
    be1 = 0.1 * jax.random.normal(kb1, (C,), jnp.float32)
    m1 = 0.1 * jax.random.normal(km1, (C,), jnp.float32)
    v1 = jnp.abs(jax.random.normal(kv1, (C,), jnp.float32)) + 0.5
    g2 = 1.0 + 0.1 * jax.random.normal(kg2, (C,), jnp.float32)
    be2 = 0.1 * jax.random.normal(kb2, (C,), jnp.float32)
    m2 = 0.1 * jax.random.normal(km2, (C,), jnp.float32)
    v2 = jnp.abs(jax.random.normal(kv2, (C,), jnp.float32)) + 0.5

    s1 = g1 / jnp.sqrt(v1 + eps)
    b1 = be1 - m1 * s1
    s2 = g2 / jnp.sqrt(v2 + eps)
    b2 = be2 - m2 * s2

    out = basic_block_forward(x, w1, w2, s1, b1, s2, b2)
    out = jax.block_until_ready(out)

    ref = ref_forward(x, w1, w2, s1, b1, s2, b2)
    assert out.shape == (N, C, H, W)
    assert jnp.allclose(out, ref, atol=1e-3, rtol=1e-3), "mismatch vs JAX reference"

    print("KERNEL_OK")
</pallas_src>

<mosaic_0001>
module attributes {stable_mosaic.version = 11 : i64} {
  func.func @basic_block_kernel(%arg0: i32, %arg1: memref<1x16x64xf32, #tpu.memory_space<vmem>>, %arg2: memref<192x64xf32, #tpu.memory_space<vmem>>, %arg3: memref<1x64xf32, #tpu.memory_space<vmem>>, %arg4: memref<1x64xf32, #tpu.memory_space<vmem>>, %arg5: memref<192x64xf32, #tpu.memory_space<vmem>>, %arg6: memref<1x64xf32, #tpu.memory_space<vmem>>, %arg7: memref<1x64xf32, #tpu.memory_space<vmem>>, %arg8: memref<1x16x64xf32, #tpu.memory_space<vmem>>) attributes {dimension_semantics = [#tpu.dimension_semantics<parallel>], iteration_bounds = array<i64: 2>, scalar_prefetch = 0 : i64, scratch_operands = 0 : i64, tpu.core_type = #tpu.core_type<tc>, window_params = [{transform_indices = @transform_0, window_bounds = array<i64: 1, 16, 64>}, {pipeline_mode = #tpu.pipeline_mode<synchronous>, transform_indices = @transform_1, window_bounds = array<i64: 192, 64>}, {pipeline_mode = #tpu.pipeline_mode<synchronous>, transform_indices = @transform_2, window_bounds = array<i64: 1, 64>}, {pipeline_mode = #tpu.pipeline_mode<synchronous>, transform_indices = @transform_3, window_bounds = array<i64: 1, 64>}, {pipeline_mode = #tpu.pipeline_mode<synchronous>, transform_indices = @transform_4, window_bounds = array<i64: 192, 64>}, {pipeline_mode = #tpu.pipeline_mode<synchronous>, transform_indices = @transform_5, window_bounds = array<i64: 1, 64>}, {pipeline_mode = #tpu.pipeline_mode<synchronous>, transform_indices = @transform_6, window_bounds = array<i64: 1, 64>}, {transform_indices = @transform_7, window_bounds = array<i64: 1, 16, 64>}]} {
    %c0 = arith.constant 0 : index
    %c0_0 = arith.constant 0 : index
    %c0_1 = arith.constant 0 : index
    %0 = vector.load %arg1[%c0, %c0_0, %c0_1] : memref<1x16x64xf32, #tpu.memory_space<vmem>>, vector<1x16x64xf32>
    %1 = vector.shape_cast %0 : vector<1x16x64xf32> to vector<16x64xf32>
    %cst = arith.constant 0.000000e+00 : f32
    %2 = vector.broadcast %cst : f32 to vector<1x64xf32>
    %3 = vector.extract_strided_slice %1 {offsets = [0, 0], sizes = [15, 64], strides = [1, 1]} : vector<16x64xf32> to vector<15x64xf32>
    %4 = tpu.concatenate %2, %3 in 0 : vector<1x64xf32>, vector<15x64xf32> -> vector<16x64xf32>
    %5 = vector.extract_strided_slice %1 {offsets = [1, 0], sizes = [15, 64], strides = [1, 1]} : vector<16x64xf32> to vector<15x64xf32>
    %6 = tpu.concatenate %5, %2 in 0 : vector<15x64xf32>, vector<1x64xf32> -> vector<16x64xf32>
    %7 = tpu.concatenate %4, %1, %6 in 1 : vector<16x64xf32>, vector<16x64xf32>, vector<16x64xf32> -> vector<16x192xf32>
    %c0_2 = arith.constant 0 : index
    %c0_3 = arith.constant 0 : index
    %8 = vector.load %arg2[%c0_2, %c0_3] : memref<192x64xf32, #tpu.memory_space<vmem>>, vector<192x64xf32>
    %cst_4 = arith.constant dense<0.000000e+00> : vector<16x64xf32>
    %9 = tpu.matmul %7, %8, %cst_4 {dimension_numbers = #tpu.dot_dimension_numbers<[1], [0], [0], [1], [0, 0, 1, 1], [], []>} : vector<16x192xf32>, vector<192x64xf32>, vector<16x64xf32> -> vector<16x64xf32>
    %c0_5 = arith.constant 0 : index
    %c0_6 = arith.constant 0 : index
    %10 = vector.load %arg3[%c0_5, %c0_6] : memref<1x64xf32, #tpu.memory_space<vmem>>, vector<1x64xf32>
    %11 = vector.broadcast %10 : vector<1x64xf32> to vector<16x64xf32>
    %12 = arith.mulf %9, %11 : vector<16x64xf32>
    %c0_7 = arith.constant 0 : index
    %c0_8 = arith.constant 0 : index
    %13 = vector.load %arg4[%c0_7, %c0_8] : memref<1x64xf32, #tpu.memory_space<vmem>>, vector<1x64xf32>
    %14 = vector.broadcast %13 : vector<1x64xf32> to vector<16x64xf32>
    %15 = arith.addf %12, %14 : vector<16x64xf32>
    %cst_9 = arith.constant 0.000000e+00 : f32
    %16 = vector.broadcast %cst_9 : f32 to vector<16x64xf32>
    %17 = arith.maximumf %15, %16 : vector<16x64xf32>
    %cst_10 = arith.constant 0.000000e+00 : f32
    %18 = vector.broadcast %cst_10 : f32 to vector<1x64xf32>
    %19 = vector.extract_strided_slice %17 {offsets = [0, 0], sizes = [15, 64], strides = [1, 1]} : vector<16x64xf32> to vector<15x64xf32>
    %20 = tpu.concatenate %18, %19 in 0 : vector<1x64xf32>, vector<15x64xf32> -> vector<16x64xf32>
    %21 = vector.extract_strided_slice %17 {offsets = [1, 0], sizes = [15, 64], strides = [1, 1]} : vector<16x64xf32> to vector<15x64xf32>
    %22 = tpu.concatenate %21, %18 in 0 : vector<15x64xf32>, vector<1x64xf32> -> vector<16x64xf32>
    %23 = tpu.concatenate %20, %17, %22 in 1 : vector<16x64xf32>, vector<16x64xf32>, vector<16x64xf32> -> vector<16x192xf32>
    %c0_11 = arith.constant 0 : index
    %c0_12 = arith.constant 0 : index
    %24 = vector.load %arg5[%c0_11, %c0_12] : memref<192x64xf32, #tpu.memory_space<vmem>>, vector<192x64xf32>
    %cst_13 = arith.constant dense<0.000000e+00> : vector<16x64xf32>
    %25 = tpu.matmul %23, %24, %cst_13 {dimension_numbers = #tpu.dot_dimension_numbers<[1], [0], [0], [1], [0, 0, 1, 1], [], []>} : vector<16x192xf32>, vector<192x64xf32>, vector<16x64xf32> -> vector<16x64xf32>
    %c0_14 = arith.constant 0 : index
    %c0_15 = arith.constant 0 : index
    %26 = vector.load %arg6[%c0_14, %c0_15] : memref<1x64xf32, #tpu.memory_space<vmem>>, vector<1x64xf32>
    %27 = vector.broadcast %26 : vector<1x64xf32> to vector<16x64xf32>
    %28 = arith.mulf %25, %27 : vector<16x64xf32>
    %c0_16 = arith.constant 0 : index
    %c0_17 = arith.constant 0 : index
    %29 = vector.load %arg7[%c0_16, %c0_17] : memref<1x64xf32, #tpu.memory_space<vmem>>, vector<1x64xf32>
    %30 = vector.broadcast %29 : vector<1x64xf32> to vector<16x64xf32>
    %31 = arith.addf %28, %30 : vector<16x64xf32>
    %32 = arith.addf %31, %1 : vector<16x64xf32>
    %cst_18 = arith.constant 0.000000e+00 : f32
    %33 = vector.broadcast %cst_18 : f32 to vector<16x64xf32>
    %34 = arith.maximumf %32, %33 : vector<16x64xf32>
    %c0_19 = arith.constant 0 : index
    %c0_20 = arith.constant 0 : index
    %c0_21 = arith.constant 0 : index
    %35 = vector.load %arg8[%c0_19, %c0_20, %c0_21] : memref<1x16x64xf32, #tpu.memory_space<vmem>>, vector<1x16x64xf32>
    %36 = vector.shape_cast %35 : vector<1x16x64xf32> to vector<16x64xf32>
    %37 = vector.shape_cast %34 : vector<16x64xf32> to vector<1x16x64xf32>
    tpu.vector_store %arg8[%c0_19, %c0_20, %c0_21], %37 {strides = array<i32>} : memref<1x16x64xf32, #tpu.memory_space<vmem>>, vector<1x16x64xf32>,
    return
  }
  func.func @transform_0(%arg0: i32) -> (i32, i32, i32) {
    %c0_i32 = arith.constant 0 : i32
    %c0_i32_0 = arith.constant 0 : i32
    %c0_i32_1 = arith.constant 0 : i32
    return %arg0, %c0_i32, %c0_i32_0 : i32, i32, i32
  }
  func.func @transform_1(%arg0: i32) -> (i32, i32) {
    %c0_i32 = arith.constant 0 : i32
    %c0_i32_0 = arith.constant 0 : i32
    %c0_i32_1 = arith.constant 0 : i32
    return %c0_i32, %c0_i32_0 : i32, i32
  }
  func.func @transform_2(%arg0: i32) -> (i32, i32) {
    %c0_i32 = arith.constant 0 : i32
    %c0_i32_0 = arith.constant 0 : i32
    %c0_i32_1 = arith.constant 0 : i32
    return %c0_i32, %c0_i32_0 : i32, i32
  }
  func.func @transform_3(%arg0: i32) -> (i32, i32) {
    %c0_i32 = arith.constant 0 : i32
    %c0_i32_0 = arith.constant 0 : i32
    %c0_i32_1 = arith.constant 0 : i32
    return %c0_i32, %c0_i32_0 : i32, i32
  }
  func.func @transform_4(%arg0: i32) -> (i32, i32) {
    %c0_i32 = arith.constant 0 : i32
    %c0_i32_0 = arith.constant 0 : i32
    %c0_i32_1 = arith.constant 0 : i32
    return %c0_i32, %c0_i32_0 : i32, i32
  }
  func.func @transform_5(%arg0: i32) -> (i32, i32) {
    %c0_i32 = arith.constant 0 : i32
    %c0_i32_0 = arith.constant 0 : i32
    %c0_i32_1 = arith.constant 0 : i32
    return %c0_i32, %c0_i32_0 : i32, i32
  }
  func.func @transform_6(%arg0: i32) -> (i32, i32) {
    %c0_i32 = arith.constant 0 : i32
    %c0_i32_0 = arith.constant 0 : i32
    %c0_i32_1 = arith.constant 0 : i32
    return %c0_i32, %c0_i32_0 : i32, i32
  }
  func.func @transform_7(%arg0: i32) -> (i32, i32, i32) {
    %c0_i32 = arith.constant 0 : i32
    %c0_i32_0 = arith.constant 0 : i32
    %c0_i32_1 = arith.constant 0 : i32
    return %arg0, %c0_i32, %c0_i32_0 : i32, i32, i32
  }
}

</mosaic_0001>

<bundles_post_ra>
// kernel: tile.23
= control target key start
LH: loop header
LB: loop body
LE: loop exit
PB: predicated region body
PF: predicated region fallthrough
CT: control target
= control target key end

     0   :  { %s28_s0 = inlined_call_operand.vmem [shape: f32[4], index: 0, kind: input, shape index: {}]   ;;  %s29_s1 = inlined_call_operand.vmem [shape: f32[16,4], index: 1, kind: output, shape index: {}]  }
   0x1   :  { %v4_v0 = vld [vmem:[%s28_s0] ss:$0 sm:$0xff] }
   0x2   :  { %5 = vst [vmem:[%s29_s1] sm:$0xff] %v4_v0  ;;  %8 = vst [vmem:[%s29_s1 + $0x8] sm:$0xff] %v4_v0 }

// kernel: tile.24
= control target key start
LH: loop header
LB: loop body
LE: loop exit
PB: predicated region body
PF: predicated region fallthrough
CT: control target
= control target key end

     0   :  { %s133_s10 = smov 60   ;;  %s134_s11 = smov 52   ;;  %vm3_vm0 = vcmask 31744   ;;  %vm9_vm1 = vcmask 523744   ;;  %vm15_vm2 = vcmask 490944   ;;  %vm21_vm3 = vcmask 458144   ;;  %s209_s0 = inlined_call_operand.vmem [shape: f32[16,4], index: 0, kind: input, shape index: {}]   ;;  %s210_s1 = inlined_call_operand.vmem [shape: f32[1,64], index: 1, kind: output, shape index: {}]  }
   0x1   :  { %v103_v0 = vld [vmem:[%s209_s0 + $0xf] sm:$0x1]   ;;  %v105_v1 = vld [vmem:[%s209_s0 + $0xd] sm:$0x1]   ;;  %v104_v2 = vld [vmem:[%s209_s0 + $0xe] sm:$0x1]  }
   0x2   :  { %7 = vrot.lane.b32.xlu0 %v103_v0, %s133_s10  ;;  %19 = vrot.lane.b32.xlu1 %v105_v1, %s134_s11  ;;  %v106_v3 = vld [vmem:[%s209_s0 + $0xc] sm:$0x1]   ;;  %s135_s16 = smov 56   ;;  %s136_s17 = smov 48   ;;  %v107_v4 = vld [vmem:[%s209_s0 + $0xb] sm:$0x1]  }
   0x3   :  { %v108_v5 = vld [vmem:[%s209_s0 + $0xa] sm:$0x1]   ;;  %v2_v6 = vld [vmem:[%s209_s0] sm:$0x1]   ;;  %s137_s24 = smov 44   ;;  %s138_s25 = smov 40  }
   0x4   :  { %4 = vst.msk [vmem:[#allocation0] sm:$0x1] %vm3_vm0, %v2_v6   ;;  %v109_v7 = vld [vmem:[%s209_s0 + $0x9] sm:$0x1]   ;;  %v110_v8 = vld [vmem:[%s209_s0 + $0x8] sm:$0x1]  }
   0x5   :  { %s139_s30 = smov 36   ;;  %s140_s2 = smov 32   ;;  %v111_v9 = vld [vmem:[%s209_s0 + $0x7] sm:$0x1]   ;;  %v112_v10 = vld [vmem:[%s209_s0 + $0x6] sm:$0x1]  }
   0x6   :  { %13 = vrot.lane.b32.xlu0 %v104_v2, %s135_s16  ;;  %25 = vrot.lane.b32.xlu1 %v106_v3, %s136_s17  ;;  %s141_s7 = smov 28   ;;  %s142_s8 = smov 24   ;;  %v113_v11 = vld [vmem:[%s209_s0 + $0x5] sm:$0x1]   ;;  %v114_v12 = vld [vmem:[%s209_s0 + $0x4] sm:$0x1]  }
   0x7   :  { %s143_s13 = smov 20   ;;  %s144_s14 = smov 16   ;;  %v115_v13 = vld [vmem:[%s209_s0 + $0x3] sm:$0x1]   ;;  %v116_v14 = vld [vmem:[%s209_s0 + $0x2] sm:$0x1]  }
   0x8   :  { %s145_s19 = smov 12   ;;  %s146_s20 = smov 8   ;;  %v117_v15 = vld [vmem:[%s209_s0 + $0x1] sm:$0x1]   ;;  %vm27_vm4 = vcmask 425344   ;;  %vm33_vm5 = vcmask 392544  }
   0x9   :  { %s147_s0 = smov 4   ;;  %vm39_vm6 = vcmask 359744   ;;  %vm45_vm7 = vcmask 326944   ;;  %vm51_vm8 = vcmask 294144   ;;  %vm57_vm9 = vcmask 261344  }
   0xa   :  { %31 = vrot.lane.b32.xlu0 %v107_v4, %s137_s24  ;;  %37 = vrot.lane.b32.xlu1 %v108_v5, %s138_s25  ;;  %vm63_vm10 = vcmask 228544   ;;  %vm69_vm11 = vcmask 195744   ;;  %vm75_vm12 = vcmask 162944   ;;  %vm81_vm13 = vcmask 130144  }
   0xb   :  { %vm87_vm14 = vcmask 97344   ;;  %vm93_vm15 = vcmask 64544  }
   0xe   :  { %43 = vrot.lane.b32.xlu0 %v109_v7, %s139_s30  ;;  %49 = vrot.lane.b32.xlu1 %v110_v8, %s140_s2 }
  0x12   :  { %55 = vrot.lane.b32.xlu0 %v111_v9, %s141_s7  ;;  %61 = vrot.lane.b32.xlu1 %v112_v10, %s142_s8 }
  0x16   :  { %67 = vrot.lane.b32.xlu0 %v113_v11, %s143_s13  ;;  %73 = vrot.lane.b32.xlu1 %v114_v12, %s144_s14 }
  0x1a   :  { %79 = vrot.lane.b32.xlu0 %v115_v13, %s145_s19  ;;  %85 = vrot.lane.b32.xlu1 %v116_v14, %s146_s20 }
  0x1e   :  { %91 = vrot.lane.b32.xlu0 %v117_v15, %s147_s0 }
  0x74   :  { %v8_v16 = vpop.permute.xlu0 %7   ;;  %v20_v17 = vpop.permute.xlu1 %19  }
  0x75   :  { %10 = vst.msk [vmem:[#allocation0] sm:$0x1] %vm9_vm1, %v8_v16  }
  0x78   :  { %v14_v18 = vpop.permute.xlu0 %13   ;;  %v26_v19 = vpop.permute.xlu1 %25  }
  0x79   :  { %16 = vst.msk [vmem:[#allocation0] sm:$0x1] %vm15_vm2, %v14_v18  }
  0x7a   :  { %22 = vst.msk [vmem:[#allocation0] sm:$0x1] %vm21_vm3, %v20_v17  }
  0x7b   :  { %28 = vst.msk [vmem:[#allocation0] sm:$0x1] %vm27_vm4, %v26_v19  }
  0x7c   :  { %v32_v20 = vpop.permute.xlu0 %31   ;;  %v38_v21 = vpop.permute.xlu1 %37  }
  0x7d   :  { %34 = vst.msk [vmem:[#allocation0] sm:$0x1] %vm33_vm5, %v32_v20  }
  0x7e   :  { %40 = vst.msk [vmem:[#allocation0] sm:$0x1] %vm39_vm6, %v38_v21  }
  0x80   :  { %v44_v22 = vpop.permute.xlu0 %43   ;;  %v50_v23 = vpop.permute.xlu1 %49  }
  0x81   :  { %46 = vst.msk [vmem:[#allocation0] sm:$0x1] %vm45_vm7, %v44_v22  }
  0x82   :  { %52 = vst.msk [vmem:[#allocation0] sm:$0x1] %vm51_vm8, %v50_v23  }
  0x84   :  { %v56_v24 = vpop.permute.xlu0 %55   ;;  %v62_v25 = vpop.permute.xlu1 %61  }
  0x85   :  { %58 = vst.msk [vmem:[#allocation0] sm:$0x1] %vm57_vm9, %v56_v24  }
  0x86   :  { %64 = vst.msk [vmem:[#allocation0] sm:$0x1] %vm63_vm10, %v62_v25  }
  0x88   :  { %v68_v26 = vpop.permute.xlu0 %67   ;;  %v74_v27 = vpop.permute.xlu1 %73  }
  0x89   :  { %70 = vst.msk [vmem:[#allocation0] sm:$0x1] %vm69_vm11, %v68_v26  }
  0x8a   :  { %76 = vst.msk [vmem:[#allocation0] sm:$0x1] %vm75_vm12, %v74_v27  }
  0x8c   :  { %v80_v28 = vpop.permute.xlu0 %79   ;;  %v86_v29 = vpop.permute.xlu1 %85  }
  0x8d   :  { %82 = vst.msk [vmem:[#allocation0] sm:$0x1] %vm81_vm13, %v80_v28  }
  0x8e   :  { %88 = vst.msk [vmem:[#allocation0] sm:$0x1] %vm87_vm14, %v86_v29  }
  0x90   :  { %v92_v30 = vpop.permute.xlu0 %91  }
  0x91   :  { %94 = vst.msk [vmem:[#allocation0] sm:$0x1] %vm93_vm15, %v92_v30  }
  0x98   :  { %v99_v31 = vld [vmem:[#allocation0] sm:$0x1] }
  0x99   :  { %102 = vst [vmem:[%s210_s1] sm:$0x1] %v99_v31 }

// kernel: basic_block_forward.1
= control target key start
LH: loop header
LB: loop body
LE: loop exit
PB: predicated region body
PF: predicated region fallthrough
CT: control target
= control target key end

     0   :  { %s714_s24 = smov 0   ;;  %s980_s0 = inlined_call_operand.vmem [shape: f32[2,16,64], index: 0, kind: input, shape index: {}]   ;;  %s981_s1 = inlined_call_operand.vmem [shape: f32[192,64], index: 1, kind: input, shape index: {}]   ;;  %s982_s2 = inlined_call_operand.vmem [shape: f32[1,64], index: 2, kind: input, shape index: {}]   ;;  %s983_s3 = inlined_call_operand.vmem [shape: f32[1,64], index: 3, kind: input, shape index: {}]   ;;  %s984_s4 = inlined_call_operand.vmem [shape: f32[192,64], index: 4, kind: input, shape index: {}]   ;;  %s985_s5 = inlined_call_operand.vmem [shape: f32[1,64], index: 5, kind: input, shape index: {}]   ;;  %s986_s6 = inlined_call_operand.vmem [shape: f32[1,64], index: 6, kind: input, shape index: {}]   ;;  %s987_s7 = inlined_call_operand.vmem [shape: f32[2,16,64], index: 7, kind: output, shape index: {}]  }
   0x1 LB: > { %s633_s25 = sadd.s32 4294967295, %s670_s24   ;;  %p637_p0 = scmp.ge.s32.totalorder %s670_s24, 1  ;;  %s670_s24 = sphi %s714_s24, %s17_s24  }
   0x2   : > { %p237_p1 = scmp.lt.s32.totalorder %s670_s24, 3 }
   0x4   : > { %p238_p2 = pnand %p637_p0, %p237_p1 }
   0x5   : > { %p269_p3 = scmp.lt.s32.totalorder (!%p238_p2), %s633_s25, 1  ;;  %s673_s15 = smov (!%p238_p2), 64  }
   0x6   : > { %241 = sbr.rel (%p238_p2) target bundleno = 652 (0x28c), region = 48 }
   0xb   : > { %v320_v0 = vld [vmem:[%s981_s1 + $0x78] sm:$0xff]  ;;  %v672_v1 = vmov 0.0   ;;  %v319_v2 = vld [vmem:[%s981_s1 + $0x70] sm:$0xff]  ;;  %s989_s25 = smov (!%p269_p3, %s633_s25), 1  ;;  %v318_v3 = vld [vmem:[%s981_s1 + $0x68] sm:$0xff]  ;;  %vm290_vm0 = vcmask 1046528  }
   0xc   : > { %334 = vmatprep.subr.mxu0 %v672_v1  ;;  %479 = vmatprep.subr.mxu1 %v672_v1  ;;  %s652_s9 = sshll.u32 %s989_s25, 4  ;;  %v317_v4 = vld [vmem:[%s981_s1 + $0x60] sm:$0xff]  ;;  %v316_v7 = vld [vmem:[%s981_s1 + $0x58] sm:$0xff]  ;;  %vm302_vm1 = vcmask 523264   ;;  %v315_v10 = vld [vmem:[%s981_s1 + $0x50] sm:$0xff]  ;;  %vm283_vm2 = vcmask 1040384  }
   0xd   : > { %335 = vmatpush1.msra.mxu0 %v320_v0  ;;  %s273_s12 = scalar_lea.vmem %s980_s0, %s652_s9  ;;  %v314_v12 = vld [vmem:[%s981_s1 + $0x48] sm:$0xff]  ;;  %v313_v13 = vld [vmem:[%s981_s1 + $0x40] sm:$0xff]  ;;  %v312_v14 = vld [vmem:[%s981_s1 + $0x38] sm:$0xff]  ;;  %s278_s18 = scalar_lea.vmem %s987_s7, %s652_s9 }
   0xe   : > { %336 = vmatprep.subr.mxu0 %v672_v1  ;;  %v746_v5 = vld [vmem:[%s273_s12] sm:$0xff]  ;;  %v748_v6 = vld [vmem:[%s273_s12 + $0x8] sm:$0xff]  ;;  %v311_v15 = vld [vmem:[%s981_s1 + $0x30] sm:$0xff] }
   0xf   : > { %337 = vmatpush1.msra.mxu0 %v319_v2  ;;  %296 = vrot.lane.b32.xlu0 %v746_v5, %s673_s15  ;;  %v291_v8 = vrot.slane %v746_v5, 1  ;;  %v292_v9 = vrot.slane %v748_v6, 1  ;;  %v310_v16 = vld [vmem:[%s981_s1 + $0x28] sm:$0xff]  ;;  %v309_v17 = vld [vmem:[%s981_s1 + $0x20] sm:$0xff]  ;;  %v308_v18 = vld [vmem:[%s981_s1 + $0x18] sm:$0xff]  ;;  %v284_v30 = vrot.slane %v746_v5, 7 }
  0x10   : > { %338 = vmatprep.subr.mxu0 %v672_v1  ;;  %v307_v19 = vld [vmem:[%s981_s1 + $0x10] sm:$0xff]  ;;  %v306_v20 = vld [vmem:[%s981_s1 + $0x8] sm:$0xff]  ;;  %v305_v21 = vld [vmem:[%s981_s1] sm:$0xff]  ;;  %v285_v31 = vrot.slane %v748_v6, 7 }
  0x11   : > { %339 = vmatpush1.msra.mxu0 %v318_v3  ;;  %v293_v11 = vsel %vm290_vm0, %v291_v8, %v292_v9  ;;  %v328_v22 = vld [vmem:[%s981_s1 + $0xb8] sm:$0xff]  ;;  %v327_v23 = vld [vmem:[%s981_s1 + $0xb0] sm:$0xff]  ;;  %v326_v24 = vld [vmem:[%s981_s1 + $0xa8] sm:$0xff]  ;;  %v289_v32 = vsel %vm283_vm2, 0.0, %v284_v30  ;;  %v295_v34 = vsel %vm290_vm0, %v292_v9, 0.0 }
  0x12   : > { %340 = vmatprep.subr.mxu0 %v672_v1  ;;  %642 = vmatprep.mubr.msk.f32.mxu0 %vm302_vm1, %v293_v11  ;;  %v325_v25 = vld [vmem:[%s981_s1 + $0xa0] sm:$0xff]  ;;  %v324_v26 = vld [vmem:[%s981_s1 + $0x98] sm:$0xff]  ;;  %v323_v27 = vld [vmem:[%s981_s1 + $0x90] sm:$0xff]  ;;  %v286_v36 = vsel %vm283_vm2, %v284_v30, %v285_v31 }
  0x13   : > { %341 = vmatpush1.msra.mxu0 %v317_v4  ;;  %298 = vrot.lane.b32.xlu0 %v748_v6, %s673_s15  ;;  %v322_v28 = vld [vmem:[%s981_s1 + $0x88] sm:$0xff]  ;;  %v321_v29 = vld [vmem:[%s981_s1 + $0x80] sm:$0xff]  ;;  %v465_v39 = vld [vmem:[%s984_s4 + $0x78] sm:$0xff] }
  0x14   : > { %342 = vmatprep.subr.mxu0 %v672_v1  ;;  %v464_v40 = vld [vmem:[%s984_s4 + $0x70] sm:$0xff]  ;;  %480 = vmatpush1.msra.mxu1 %v465_v39  ;;  %v463_v41 = vld [vmem:[%s984_s4 + $0x68] sm:$0xff]  ;;  %v462_v42 = vld [vmem:[%s984_s4 + $0x60] sm:$0xff] }
  0x15   : > { %343 = vmatpush1.msra.mxu0 %v316_v7  ;;  %481 = vmatprep.subr.mxu1 %v672_v1  ;;  %v461_v43 = vld [vmem:[%s984_s4 + $0x58] sm:$0xff]  ;;  %v460_v44 = vld [vmem:[%s984_s4 + $0x50] sm:$0xff]  ;;  %v459_v45 = vld [vmem:[%s984_s4 + $0x48] sm:$0xff] }
  0x16   : > { %344 = vmatprep.subr.mxu0 %v672_v1  ;;  %482 = vmatpush1.msra.mxu1 %v464_v40  ;;  %v458_v46 = vld [vmem:[%s984_s4 + $0x40] sm:$0xff]  ;;  %v457_v47 = vld [vmem:[%s984_s4 + $0x38] sm:$0xff]  ;;  %v456_v48 = vld [vmem:[%s984_s4 + $0x30] sm:$0xff] }
  0x17   : > { %345 = vmatpush1.msra.mxu0 %v315_v10  ;;  %483 = vmatprep.subr.mxu1 %v672_v1  ;;  %v455_v49 = vld [vmem:[%s984_s4 + $0x28] sm:$0xff]  ;;  %v454_v50 = vld [vmem:[%s984_s4 + $0x20] sm:$0xff]  ;;  %v453_v51 = vld [vmem:[%s984_s4 + $0x18] sm:$0xff] }
  0x18   : > { %346 = vmatprep.subr.mxu0 %v672_v1  ;;  %484 = vmatpush1.msra.mxu1 %v463_v41  ;;  %v452_v52 = vld [vmem:[%s984_s4 + $0x10] sm:$0xff]  ;;  %v451_v53 = vld [vmem:[%s984_s4 + $0x8] sm:$0xff]  ;;  %v450_v54 = vld [vmem:[%s984_s4] sm:$0xff] }
  0x19   : > { %347 = vmatpush1.msra.mxu0 %v314_v12  ;;  %485 = vmatprep.subr.mxu1 %v672_v1  ;;  %v473_v55 = vld [vmem:[%s984_s4 + $0xb8] sm:$0xff]  ;;  %v472_v56 = vld [vmem:[%s984_s4 + $0xb0] sm:$0xff]  ;;  %v471_v57 = vld [vmem:[%s984_s4 + $0xa8] sm:$0xff] }
  0x1a   : > { %348 = vmatprep.subr.mxu0 %v672_v1  ;;  %486 = vmatpush1.msra.mxu1 %v462_v42  ;;  %v470_v58 = vld [vmem:[%s984_s4 + $0xa0] sm:$0xff]  ;;  %v469_v59 = vld [vmem:[%s984_s4 + $0x98] sm:$0xff]  ;;  %v468_v60 = vld [vmem:[%s984_s4 + $0x90] sm:$0xff] }
  0x1b   : > { %349 = vmatpush1.msra.mxu0 %v313_v13  ;;  %487 = vmatprep.subr.mxu1 %v672_v1  ;;  %v467_v61 = vld [vmem:[%s984_s4 + $0x88] sm:$0xff]  ;;  %v466_v62 = vld [vmem:[%s984_s4 + $0x80] sm:$0xff] }
  0x1c   : > { %350 = vmatprep.subr.mxu0 %v672_v1  ;;  %488 = vmatpush1.msra.mxu1 %v461_v43  ;;  %v644_v63 = vld [vmem:[%s982_s2] ss:$0 sm:$0xff] }
  0x1d   : > { %351 = vmatpush1.msra.mxu0 %v312_v14  ;;  %489 = vmatprep.subr.mxu1 %v672_v1  ;;  %v645_v2 = vld [vmem:[%s983_s3] ss:$0 sm:$0xff] }
  0x1e   : > { %352 = vmatprep.subr.mxu0 %v672_v1  ;;  %490 = vmatpush1.msra.mxu1 %v460_v44 }
  0x1f   : > { %353 = vmatpush1.msra.mxu0 %v311_v15  ;;  %491 = vmatprep.subr.mxu1 %v672_v1 }
  0x20   : > { %354 = vmatprep.subr.mxu0 %v672_v1  ;;  %492 = vmatpush1.msra.mxu1 %v459_v45 }
  0x21   : > { %355 = vmatpush1.msra.mxu0 %v310_v16  ;;  %493 = vmatprep.subr.mxu1 %v672_v1 }
  0x22   : > { %356 = vmatprep.subr.mxu0 %v672_v1  ;;  %494 = vmatpush1.msra.mxu1 %v458_v46 }
  0x23   : > { %357 = vmatpush1.msra.mxu0 %v309_v17  ;;  %495 = vmatprep.subr.mxu1 %v672_v1 }
  0x24   : > { %358 = vmatprep.subr.mxu0 %v672_v1  ;;  %496 = vmatpush1.msra.mxu1 %v457_v47 }
  0x25   : > { %359 = vmatpush1.msra.mxu0 %v308_v18  ;;  %497 = vmatprep.subr.mxu1 %v672_v1 }
  0x26   : > { %360 = vmatprep.subr.mxu0 %v672_v1  ;;  %498 = vmatpush1.msra.mxu1 %v456_v48 }
  0x27   : > { %361 = vmatpush1.msra.mxu0 %v307_v19  ;;  %499 = vmatprep.subr.mxu1 %v672_v1 }
  0x28   : > { %362 = vmatprep.subr.mxu0 %v672_v1  ;;  %500 = vmatpush1.msra.mxu1 %v455_v49 }
  0x29   : > { %363 = vmatpush1.msra.mxu0 %v306_v20  ;;  %501 = vmatprep.subr.mxu1 %v672_v1 }
  0x2a   : > { %364 = vmatprep.subr.mxu0 %v672_v1  ;;  %502 = vmatpush1.msra.mxu1 %v454_v50 }
  0x2b   : > { %365 = vmatpush1.msra.mxu0 %v305_v21  ;;  %503 = vmatprep.subr.mxu1 %v672_v1 }
  0x2c   : > { %382 = vmatprep.subr.mxu0 %v672_v1  ;;  %504 = vmatpush1.msra.mxu1 %v453_v51 }
  0x2d   : > { %383 = vmatpush2.msra.mxu0 %v328_v22  ;;  %505 = vmatprep.subr.mxu1 %v672_v1 }
  0x2e   : > { %384 = vmatprep.subr.mxu0 %v672_v1  ;;  %506 = vmatpush1.msra.mxu1 %v452_v52 }
  0x2f   : > { %385 = vmatpush2.msra.mxu0 %v327_v23  ;;  %507 = vmatprep.subr.mxu1 %v672_v1 }
  0x30   : > { %386 = vmatprep.subr.mxu0 %v672_v1  ;;  %508 = vmatpush1.msra.mxu1 %v451_v53 }
  0x31   : > { %387 = vmatpush2.msra.mxu0 %v326_v24  ;;  %509 = vmatprep.subr.mxu1 %v672_v1 }
  0x32   : > { %388 = vmatprep.subr.mxu0 %v672_v1  ;;  %510 = vmatpush1.msra.mxu1 %v450_v54 }
  0x33   : > { %389 = vmatpush2.msra.mxu0 %v325_v25  ;;  %527 = vmatprep.subr.mxu1 %v672_v1  ;;  %v648_v25 = vld [vmem:[%s985_s5] ss:$0 sm:$0xff] }
  0x34   : > { %390 = vmatprep.subr.mxu0 %v672_v1  ;;  %528 = vmatpush2.msra.mxu1 %v473_v55 }
  0x35   : > { %391 = vmatpush2.msra.mxu0 %v324_v26  ;;  %529 = vmatprep.subr.mxu1 %v672_v1 }
  0x36   : > { %392 = vmatprep.subr.mxu0 %v672_v1  ;;  %530 = vmatpush2.msra.mxu1 %v472_v56 }
  0x37   : > { %393 = vmatpush2.msra.mxu0 %v323_v27  ;;  %531 = vmatprep.subr.mxu1 %v672_v1  ;;  %v649_v27 = vld [vmem:[%s986_s6] ss:$0 sm:$0xff] }
  0x38   : > { %394 = vmatprep.subr.mxu0 %v672_v1  ;;  %532 = vmatpush2.msra.mxu1 %v471_v57 }
  0x39   : > { %395 = vmatpush2.msra.mxu0 %v322_v28  ;;  %533 = vmatprep.subr.mxu1 %v672_v1 }
  0x3a   : > { %396 = vmatprep.subr.mxu0 %v672_v1  ;;  %534 = vmatpush2.msra.mxu1 %v470_v58 }
  0x3b   : > { %397 = vmatpush2.msra.mxu0 %v321_v29  ;;  %535 = vmatprep.subr.mxu1 %v672_v1 }
  0x3c   : > { %536 = vmatpush2.msra.mxu1 %v469_v59 }
  0x3d   : > { %537 = vmatprep.subr.mxu1 %v672_v1 }
  0x3e   : > { %538 = vmatpush2.msra.mxu1 %v468_v60 }
  0x3f   : > { %539 = vmatprep.subr.mxu1 %v672_v1 }
  0x40   : > { %540 = vmatpush2.msra.mxu1 %v467_v61 }
  0x41   : > { %541 = vmatprep.subr.mxu1 %v672_v1 }
  0x42   : > { %542 = vmatpush2.msra.mxu1 %v466_v62 }
  0x81   : > { %v297_v33 = vpop.permute.xlu0 %296 }
  0x82   : > { %v303_v35 = vsel %vm302_vm1, %v289_v32, %v297_v33 }
  0x83   : > { %399 = vmatmul.mubr.f32.vlgmr.msra.gmra.mxu0 %v303_v35 }
  0x84   : > { %643 = vmatprep.mubr.msk.f32.mxu0 %vm302_vm1, %v295_v34 }
  0x85   : > { %v299_v37 = vpop.permute.xlu0 %298 }
  0x86   : > { %v304_v38 = vsel %vm302_vm1, %v286_v36, %v299_v37 }
  0x87   : > { %404 = vmatmul.mubr.f32.gmra.mxu0 %v304_v38 }
 0x143   : > { %v400_v0 = vpop.f32.mrf.mxu0 }
 0x144   : > { %v416_v3 = vmul.f32 %v644_v63, %v400_v0 }
 0x145   : > { %v402_v4 = vpop.f32.mrf.mxu0 }
 0x146   : > { %v425_v7 = vadd.f32 %v645_v2, %v416_v3 }
 0x147   : > { %v405_v8 = vpop.f32.mrf.mxu0 }
 0x148   : > { %v427_v9 = vmax.f32 %v425_v7, 0.0  ;;  %v417_v1 = vmul.f32 %v644_v63, %v405_v8 }
 0x149   : > { %v407_v10 = vpop.f32.mrf.mxu0 }
 0x14a   : > { %v426_v11 = vadd.f32 %v645_v2, %v417_v1  ;;  %442 = vrot.lane.b32.xlu1 %v427_v9, %s673_s15  ;;  %v437_v14 = vrot.slane %v427_v9, 1  ;;  %v431_v16 = vrot.slane %v427_v9, 7 }
 0x14c   : > { %v428_v12 = vmax.f32 %v426_v11, 0.0  ;;  %v436_v20 = vsel %vm283_vm2, 0.0, %v431_v16 }
 0x14e   : > { %v432_v13 = vrot.slane %v428_v12, 7  ;;  %444 = vrot.lane.b32.xlu1 %v428_v12, %s673_s15  ;;  %v438_v15 = vrot.slane %v428_v12, 1 }
 0x150   : > { %v439_v17 = vsel %vm290_vm0, %v437_v14, %v438_v15  ;;  %v433_v18 = vsel %vm283_vm2, %v431_v16, %v432_v13  ;;  %v441_v22 = vsel %vm290_vm0, %v438_v15, 0.0 }
 0x151   : > { %646 = vmatprep.mubr.msk.f32.mxu1 %vm302_vm1, %v439_v17 }
 0x1bc   : > { %v443_v19 = vpop.permute.xlu1 %442 }
 0x1bd   : > { %v448_v21 = vsel %vm302_vm1, %v436_v20, %v443_v19 }
 0x1be   : > { %544 = vmatmul.mubr.f32.vlgmr.msra.gmra.mxu1 %v448_v21 }
 0x1bf   : > { %647 = vmatprep.mubr.msk.f32.mxu1 %vm302_vm1, %v441_v22 }
 0x1c0   : > { %v445_v23 = vpop.permute.xlu1 %444 }
 0x1c1   : > { %v449_v24 = vsel %vm302_vm1, %v433_v18, %v445_v23 }
 0x1c2   : > { %549 = vmatmul.mubr.f32.gmra.mxu1 %v449_v24 }
 0x27e   : > { %v545_v26 = vpop.f32.mrf.mxu1 }
 0x27f   : > { %v561_v28 = vmul.f32 %v648_v25, %v545_v26 }
 0x280   : > { %v547_v29 = vpop.f32.mrf.mxu1 }
 0x281   : > { %v570_v30 = vadd.f32 %v649_v27, %v561_v28 }
 0x282   : > { %v550_v31 = vpop.f32.mrf.mxu1 }
 0x283   : > { %v572_v32 = vadd.f32 %v570_v30, %v746_v5  ;;  %v562_v33 = vmul.f32 %v648_v25, %v550_v31 }
 0x284   : > { %v552_v34 = vpop.f32.mrf.mxu1 }
 0x285   : > { %v574_v35 = vmax.f32 %v572_v32, 0.0  ;;  %v571_v36 = vadd.f32 %v649_v27, %v562_v33 }
 0x287   : > { %576 = vst.msk [vmem:[%s278_s18] sm:$0xff] %vm302_vm1, %v574_v35  ;;  %v573_v37 = vadd.f32 %v571_v36, %v748_v6 }
 0x289   : > { %v575_v38 = vmax.f32 %v573_v37, 0.0 }
 0x28b   : > { %577 = vst.msk [vmem:[%s278_s18 + $0x8] sm:$0xff] %vm302_vm1, %v575_v38 }
 0x28c PF: > { %s17_s24 = sadd.s32 1, %s670_s24  }
 0x28d   : > { %p14_p4 = scmp.ge.s32.totalorder %s17_s24, 4  }
 0x28f   :  { %16 = sbr.rel (!%p14_p4) target bundleno = 1 (0x1), region = 78 }

</bundles_post_ra>
